<compile_context>
chip_gen: v7x
topology: tpu7x:2x2x1
jax: 0.10.0
libtpu: 0.0.40
codegen_flags: <defaults>
</compile_context>

<pallas_src>
import jax
import jax.numpy as jnp
from jax.experimental import pallas as pl
from jax.experimental.pallas import tpu as pltpu

COEF = 0.97  # matches PreEmphasis(coef=0.97)


def _preemphasis_kernel(x_ref, o_ref, carry_ref):
    """One (TB, TT) tile of the pre-emphasis filter."""
    t = pl.program_id(1)
    x = x_ref[...]  # (TB, TT)

    # Bulk: prev[:, j] = x[:, j-1] via an XLU rotate (column 0 fixed below).
    prev = pltpu.roll(x, shift=1, axis=1)  # positive axis (pltpu.roll requirement)
    o_ref[...] = x - COEF * prev

    @pl.when(t == 0)
    def _():
        # Reflect pad: the sample before x[:, 0] is x[:, 1].
        o_ref[:, 0:1] = x[:, 0:1] - COEF * x[:, 1:2]

    @pl.when(t != 0)
    def _():
        # The sample before this tile's first column is the previous T tile's
        # last column, carried in VMEM scratch.
        o_ref[:, 0:1] = x[:, 0:1] - COEF * carry_ref[...]

    # Stash this tile's last column for the next T tile of the same batch tile
    # (time is the innermost grid axis, so iterations for a fixed batch tile
    # run consecutively).
    carry_ref[...] = x[:, x.shape[1] - 1:]


def _target_block_bytes() -> int:
    """Per-block HBM traffic target; bigger on v7x (3.2 TB/s HBM, 64 MiB VMEM)."""
    try:
        kind = jax.devices()[0].device_kind.lower()
    except Exception:  # pragma: no cover - defensive
        kind = ""
    return (8 if "v7" in kind else 4) * 1024 * 1024


def _choose_tiles(B: int, T: int, dtype) -> tuple[int, int]:
    """Pick (batch_tile, time_tile) honoring the (8,128) rule and VMEM budget."""
    itemsize = jnp.dtype(dtype).itemsize
    sub = max(8, 32 // itemsize)  # 8 for f32, 16 for bf16, 32 for int8/fp8
    target = _target_block_bytes()

    # Batch tile: full extent if tiny (allowed by the block rule), otherwise a
    # multiple of `sub`, capped near B/2 so the "parallel" batch axis has at
    # least 2 steps (keeps both v7x TensorCores busy; no-op on v5e/v6e).
    if B <= sub:
        tb = B
    elif B >= 2 * sub:
        tb = max(sub, ((B // 2) // sub) * sub)
    else:
        tb = sub

    # If a full-T row slab is still too big, shrink tb (in multiples of sub)
    # before resorting to T tiling.
    while tb > sub and tb * T * itemsize > target:
        tb = max(sub, ((tb // 2) // sub) * sub)

    # Time tile: whole T when it fits (lane-dense, unmasked stores), otherwise
    # a large multiple of 128 lanes; the VMEM carry handles tile boundaries.
    if tb * T * itemsize <= target:
        tt = T
    else:
        tt = max(128, ((target // (tb * itemsize)) // 128) * 128)
        tt = min(tt, T)
    return tb, tt


def preemphasis(x: jax.Array, *, donate: bool = False) -> jax.Array:
    """x: (B, T) -> (B, T), pre-emphasized (y[t] = x[t] - 0.97*x[t-1])."""
    B, T = x.shape
    assert T >= 2, "reflect pad of width 1 requires T >= 2 (as in PyTorch)"

    tb, tt = _choose_tiles(B, T, x.dtype)
    grid = (pl.cdiv(B, tb), pl.cdiv(T, tt))
    itemsize = jnp.dtype(x.dtype).itemsize

    return pl.pallas_call(
        _preemphasis_kernel,
        out_shape=jax.ShapeDtypeStruct((B, T), x.dtype),
        grid=grid,
        in_specs=[pl.BlockSpec((tb, tt), lambda i, t: (i, t))],
        out_specs=pl.BlockSpec((tb, tt), lambda i, t: (i, t)),
        scratch_shapes=[pltpu.VMEM((tb, 1), x.dtype)],
        compiler_params=pltpu.CompilerParams(
            dimension_semantics=("parallel", "arbitrary"),
            vmem_limit_bytes=48 * 1024 * 1024,
        ),
        cost_estimate=pl.CostEstimate(
            flops=2 * B * T,
            transcendentals=0,
            bytes_accessed=2 * B * T * itemsize,
        ),
        # Donation avoids an extra HBM allocation when the caller can give up x.
        input_output_aliases={0: 0} if donate else {},
    )(x)


def _reference(x: jax.Array) -> jax.Array:
    # Pure-JAX reference mirroring the PyTorch forward (reflect pad + conv1d).
    padded = jnp.concatenate([x[:, 1:2], x], axis=1)  # reflect pad left by 1
    return padded[:, 1:] - COEF * padded[:, :-1]


if __name__ == "__main__":
    key = jax.random.PRNGKey(0)
    # Small demo shape: B multiple of 8 (so the batch axis splits into 2
    # parallel tiles of 8), T a multiple of 128 (lane-dense, unmasked stores).
    B, T = 16, 512
    x = jax.random.normal(key, (B, T), dtype=jnp.float32)

    y = preemphasis(x)
    y = jax.block_until_ready(y)

    y_ref = _reference(x)
    assert y.shape == (B, T)
    assert jnp.allclose(y, y_ref, atol=1e-6, rtol=1e-6)

    print("KERNEL_OK")
</pallas_src>

<mosaic_0001>
module attributes {stable_mosaic.version = 11 : i64} {
  func.func @_preemphasis_kernel(%arg0: i32, %arg1: i32, %arg2: memref<8x512xf32, #tpu.memory_space<vmem>>, %arg3: memref<8x512xf32, #tpu.memory_space<vmem>>, %arg4: memref<8x1xf32, #tpu.memory_space<vmem>>) attributes {dimension_semantics = [#tpu.dimension_semantics<parallel>, #tpu.dimension_semantics<arbitrary>], iteration_bounds = array<i64: 2, 1>, scalar_prefetch = 0 : i64, scratch_operands = 1 : i64, tpu.core_type = #tpu.core_type<tc>, window_params = [{transform_indices = @transform_0, window_bounds = array<i64: 8, 512>}, {transform_indices = @transform_1, window_bounds = array<i64: 8, 512>}]} {
    %c0 = arith.constant 0 : index
    %c0_0 = arith.constant 0 : index
    %0 = vector.load %arg2[%c0, %c0_0] : memref<8x512xf32, #tpu.memory_space<vmem>>, vector<8x512xf32>
    %c1_i32 = arith.constant 1 : i32
    %1 = tpu.dynamic_rotate %0 by %c1_i32 dim 1 : vector<8x512xf32>, i32 -> vector<8x512xf32>
    %cst = arith.constant 9.700000e-01 : f32
    %2 = vector.broadcast %cst : f32 to vector<8x512xf32>
    %3 = arith.mulf %2, %1 : vector<8x512xf32>
    %4 = arith.subf %0, %3 : vector<8x512xf32>
    %c0_1 = arith.constant 0 : index
    %c0_2 = arith.constant 0 : index
    %5 = vector.load %arg3[%c0_1, %c0_2] : memref<8x512xf32, #tpu.memory_space<vmem>>, vector<8x512xf32>
    tpu.vector_store %arg3[%c0_1, %c0_2], %4 {strides = array<i32>} : memref<8x512xf32, #tpu.memory_space<vmem>>, vector<8x512xf32>,
    %c0_i32 = arith.constant 0 : i32
    %6 = arith.cmpi eq, %arg1, %c0_i32 : i32
    %7 = arith.extui %6 : i1 to i32
    %c0_i32_3 = arith.constant 0 : i32
    %8 = arith.cmpi ne, %7, %c0_i32_3 : i32
    scf.if %8 {
      %14 = vector.extract_strided_slice %0 {offsets = [0, 0], sizes = [8, 1], strides = [1, 1]} : vector<8x512xf32> to vector<8x1xf32>
      %15 = vector.extract_strided_slice %0 {offsets = [0, 1], sizes = [8, 1], strides = [1, 1]} : vector<8x512xf32> to vector<8x1xf32>
      %cst_8 = arith.constant 9.700000e-01 : f32
      %16 = vector.broadcast %cst_8 : f32 to vector<8x1xf32>
      %17 = arith.mulf %16, %15 : vector<8x1xf32>
      %18 = arith.subf %14, %17 : vector<8x1xf32>
      %c0_9 = arith.constant 0 : index
      %c0_10 = arith.constant 0 : index
      %19 = vector.load %arg3[%c0_9, %c0_10] : memref<8x512xf32, #tpu.memory_space<vmem>>, vector<8x1xf32>
      tpu.vector_store %arg3[%c0_9, %c0_10], %18 {strides = array<i32>} : memref<8x512xf32, #tpu.memory_space<vmem>>, vector<8x1xf32>,
    } else {
    }
    %c0_i32_4 = arith.constant 0 : i32
    %9 = arith.cmpi ne, %arg1, %c0_i32_4 : i32
    %10 = arith.extui %9 : i1 to i32
    %c0_i32_5 = arith.constant 0 : i32
    %11 = arith.cmpi ne, %10, %c0_i32_5 : i32
    scf.if %11 {
      %14 = vector.extract_strided_slice %0 {offsets = [0, 0], sizes = [8, 1], strides = [1, 1]} : vector<8x512xf32> to vector<8x1xf32>
      %c0_8 = arith.constant 0 : index
      %c0_9 = arith.constant 0 : index
      %15 = vector.load %arg4[%c0_8, %c0_9] : memref<8x1xf32, #tpu.memory_space<vmem>>, vector<8x1xf32>
      %cst_10 = arith.constant 9.700000e-01 : f32
      %16 = vector.broadcast %cst_10 : f32 to vector<8x1xf32>
      %17 = arith.mulf %16, %15 : vector<8x1xf32>
      %18 = arith.subf %14, %17 : vector<8x1xf32>
      %c0_11 = arith.constant 0 : index
      %c0_12 = arith.constant 0 : index
      %19 = vector.load %arg3[%c0_11, %c0_12] : memref<8x512xf32, #tpu.memory_space<vmem>>, vector<8x1xf32>
      tpu.vector_store %arg3[%c0_11, %c0_12], %18 {strides = array<i32>} : memref<8x512xf32, #tpu.memory_space<vmem>>, vector<8x1xf32>,
    } else {
    }
    %12 = vector.extract_strided_slice %0 {offsets = [0, 511], sizes = [8, 1], strides = [1, 1]} : vector<8x512xf32> to vector<8x1xf32>
    %c0_6 = arith.constant 0 : index
    %c0_7 = arith.constant 0 : index
    %13 = vector.load %arg4[%c0_6, %c0_7] : memref<8x1xf32, #tpu.memory_space<vmem>>, vector<8x1xf32>
    tpu.vector_store %arg4[%c0_6, %c0_7], %12 {strides = array<i32>} : memref<8x1xf32, #tpu.memory_space<vmem>>, vector<8x1xf32>,
    return
  }
  func.func @transform_0(%arg0: i32, %arg1: i32) -> (i32, i32) {
    %c0_i32 = arith.constant 0 : i32
    return %arg0, %arg1 : i32, i32
  }
  func.func @transform_1(%arg0: i32, %arg1: i32) -> (i32, i32) {
    %c0_i32 = arith.constant 0 : i32
    return %arg0, %arg1 : i32, i32
  }
}

</mosaic_0001>

<bundles_post_ra>
// kernel: tpu_custom_call.1
= control target key start
LH: loop header
LB: loop body
LE: loop exit
PB: predicated region body
PF: predicated region fallthrough
CT: control target
= control target key end

     0   :  { %6 = vsyncpa [#allocation4], 0  ;;  %s698_s0 = inlined_call_operand.hbm [shape: f32[16,512], index: 0, kind: input, shape index: {}]   ;;  %s699_s1 = inlined_call_operand.hbm [shape: f32[16,512], index: 1, kind: output, shape index: {}]  }
   0x1   :  { %8 = vsyncpa [#allocation4 + $0x1], 0 }
   0x2   :  { %9 = vsyncpa [#allocation5], 0 }
   0x3   :  { %11 = vsyncpa [#allocation5 + $0x1], 0  ;;  %s521_s6 = smov 0   ;;  %s523_s7 = smov 0  }
   0x4   :  { %s525_s8 = smov 0   ;;  %s527_s9 = smov 0  }
   0x5   :  { %s529_s10 = smov 0   ;;  %s531_s11 = smov 0  }
   0x6 LB: > { %s312_s12 = sadd.s32 4294967295, %s505_s11   ;;  %s313_s13 = sadd.s32 4294967294, %s505_s11   ;;  %s505_s11 = sphi %s531_s11, %s17_s11   ;;  %s501_s10 = sphi %s529_s10, %s715_s10   ;;  %s497_s9 = sphi %s527_s9, %s714_s9   ;;  %s493_s8 = sphi %s525_s8, %s713_s8   ;;  %s489_s7 = sphi %s523_s7, %s712_s7   ;;  %s485_s6 = sphi %s521_s6, %s711_s6  }
   0x7   : > { %s29_s14 = sadd.s32 1, %s501_s10  ;;  %s38_s15 = sadd.s32 1, %s493_s8 }
   0x8   : > { %p31_p0 = scmp.ge.s32.totalorder %s29_s14, 2  ;;  %p45_p1 = scmp.ne.s32.totalorder %s493_s8, %s489_s7 }
   0x9   : > { %p46_p2 = scmp.eq.s32.totalorder %s505_s11, 0  ;;  %p51_p3 = scmp.ne.s32.totalorder %s489_s7, %s485_s6 }
   0xa   : > { %s717_s14 = smov (%p31_p0, %s29_s14), 0  ;;  %p52_p5 = scmp.eq.s32.totalorder %s312_s12, 0 }
   0xb   : > { %p562_p4 = por %p46_p2, %p45_p1  ;;  %s33_s17 = ssub.s32 %s501_s10, %s717_s14 }
   0xc   : > { %p77_p6 = scmp.eq.s32.totalorder %s312_s12, 1  ;;  %p36_p7 = scmp.eq.s32.totalorder %s33_s17, 0 }
   0xd   : > { %p568_p8 = por %p52_p5, %p51_p3  ;;  %p83_p10 = scmp.eq.s32.totalorder %s313_s13, 1 }
   0xe   : > { %p572_p9 = por %p77_p6, %p45_p1  ;;  %p341_p13 = scmp.lt.s32.totalorder %s505_s11, 2 }
   0xf   : > { %s577_s20 = scalar_select %p36_p7, %s493_s8, %s38_s15  }
  0x10   : > { %s703_s19 = scalar_select %p572_p9, 1, 0 }
  0x11   : > { %p579_p11 = por %p83_p10, %p51_p3  ;;  %s103_s22 = sand.u32 1, %s493_s8  }
  0x12   : > { %s316_s23 = sshll.u32 %s103_s22, 5  ;;  %s327_s24 = sshll.u32 %s501_s10, 9 }
  0x13   : > { %s704_s21 = scalar_select %p579_p11, 1, 0 }
  0x14   : > { %s590_s27 = scalar_lea.hbm %s698_s0, %s327_s24  ;;  %s107_s28 = scalar_lea.vmem [#allocation3], %s316_s23 }
  0x15   : > { %s117_s29 = sshll.u32 %s107_s28, 4  ;;  %p596_p0 = pnand %p341_p13, %p562_p4  ;;  %s592_s29 = int_to_ptr.vmem [resolvable:$true] %s117_s29 }
  0x16   : > { %s104_s2 = scalar_lea.sflag [#allocation4], %s103_s22  ;;  %s393_s3 = scalar_lea.hbm %s590_s27, 512 }
  0x17   : > { %p394_p3 = scmp.ne.s32.totalorder %s590_s27, %s393_s3  ;;  %p395_p5 = pneg %p596_p0 }
  0x18   : > { %s398_s12 = scalar_lea.hbm %s698_s0, 1024  ;;  %p399_p4 = scmp.lt.u32.totalorder %s590_s27, %s698_s0 }
  0x19   : > { %p396_p6 = pnand %p395_p5, %p394_p3  ;;  %p400_p10 = scmp.lt.u32.totalorder %s398_s12, %s393_s3 }
  0x1a   : > { %p402_p12 = scmp.lt.u32.totalorder %s393_s3, %s590_s27 }
  0x1b   : > { %p397_p7 = pneg %p396_p6  ;;  %p401_p13 = por %p400_p10, %p399_p4 }
  0x1d   : > { %p403_p1 = por %p402_p12, %p401_p13 }
  0x1f   : > { %p404_p2 = pnand %p403_p1, %p397_p7 }
  0x21   : > { %407 = shalt.err (!%p404_p2)
}
  0x22   : > { %s408_s16 = scalar_lea.vmem %s592_s29, 512  ;;  %s507_s17 = smov [#allocation3]  }
  0x23   : > { %p409_p3 = scmp.ne.s32.totalorder %s592_s29, %s408_s16  ;;  %s413_s22 = sshll.u32 %s507_s17, 4  ;;  %s414_s22 = int_to_ptr.vmem [resolvable:$false] %s413_s22 }
  0x24   : > { %s415_s23 = scalar_lea.vmem %s414_s22, 1024  ;;  %p416_p9 = scmp.lt.s32.totalorder %s592_s29, %s414_s22 }
  0x25   : > { %p411_p6 = pnand %p409_p3, %p395_p5  ;;  %p417_p4 = scmp.lt.s32.totalorder %s415_s23, %s408_s16 }
  0x27   : > { %p412_p11 = pneg %p411_p6  ;;  %p418_p10 = por %p417_p4, %p416_p9 }
  0x29   : > { %p419_p12 = pnand %p418_p10, %p412_p11 }
  0x2b   : > { %422 = shalt.err (!%p419_p12)
}
  0x2c   : > { %336 = dma.hbm_to_vmem [thread:$0]  (!%p596_p0), %s590_s27, 512, %s592_s29, %s104_s2  }
  0x2d   : > { %p706_p1 = scmp.lt.s32.totalorder %s505_s11, 3  ;;  %p707_p2 = scmp.ge.s32.totalorder %s505_s11, 1 }
  0x2f   : > { %p123_p5 = pnand %p707_p2, %p706_p1 }
  0x30   : > { %s632_s24 = sand.u32 (!%p123_p5), 1, %s489_s7  }
  0x31   : > { %126 = sbr.rel (%p123_p5) target bundleno = 197 (0xc5), region = 24  ;;  %s320_s25 = sshll.u32 (!%p123_p5), %s632_s24, 5 }
  0x32   : > { %s129_s26 = scalar_lea.sflag (!%p123_p5), [#allocation4], %s632_s24  ;;  %s132_s28 = scalar_lea.vmem (!%p123_p5), [#allocation3], %s320_s25 }
  0x38   : > { %476 = dma.done.wait (%p568_p8), %s129_s26, 512  }
  0x39   : > { %478 = vsyncadd (%p568_p8), %s129_s26, 4294966784  ;;  %v154_v0 = vld [vmem:[%s132_s28 + $0x8] sm:$0xff]  ;;  %v153_v1 = vld [vmem:[%s132_s28] sm:$0xff]  ;;  %s508_s27 = smov 1   ;;  %s509_s29 = smov 127   ;;  %v165_v5 = vlaneseq  ;;  %vm194_vm1 = vcmask 7168  }
  0x3a   : > { %159 = vrot.lane.b32.xlu1 %v154_v0, %s508_s27  ;;  %157 = vrot.lane.b32.xlu0 %v153_v1, %s508_s27  ;;  %v155_v2 = vld [vmem:[%s132_s28 + $0x10] sm:$0xff]  ;;  %v156_v3 = vld [vmem:[%s132_s28 + $0x18] sm:$0xff]  ;;  %v188_v4 = vmul.f32 0.97, %v153_v1  ;;  %s328_s18 = sshll.u32 %s497_s9, 9  ;;  %s150_s30 = scalar_lea.vmem [#allocation6], %s320_s25 }
  0x3b   : > { %v166_v6 = vand.u32 127, %v165_v5  ;;  %s228_s2 = sshll.u32 %s150_s30, 4  ;;  %s648_s5 = scalar_lea.hbm %s699_s1, %s328_s18  ;;  %s650_s2 = int_to_ptr.vmem [resolvable:$true] %s228_s2 }
  0x3c   : > { %s212_s9 = scalar_lea.sflag [#allocation5], %s632_s24  ;;  %s423_s12 = scalar_lea.vmem %s650_s2, 512 }
  0x3d   : > { %vm167_vm0 = vcmp.lt.s32.totalorder %v166_v6, 1  ;;  %p424_p8 = scmp.ne.s32.totalorder %s650_s2, %s423_s12  ;;  %p708_p9 = scmp.ne.s32.totalorder %s703_s19, 0 }
  0x3e   : > { %161 = vrot.lane.b32.xlu1 %v155_v2, %s508_s27  ;;  %163 = vrot.lane.b32.xlu0 %v156_v3, %s508_s27  ;;  %s510_s13 = smov [#allocation6]  }
  0x3f   : > { %p425_p11 = pnand %p424_p8, %p708_p9  ;;  %s427_s15 = sshll.u32 %s510_s13, 4  ;;  %s428_s15 = int_to_ptr.vmem [resolvable:$false] %s427_s15 }
  0x40   : > { %s429_s16 = scalar_lea.vmem %s428_s15, 1024  ;;  %p430_p7 = scmp.lt.s32.totalorder %s650_s2, %s428_s15 }
  0x41   : > { %p426_p0 = pneg %p425_p11  ;;  %p431_p13 = scmp.lt.s32.totalorder %s429_s16, %s423_s12 }
  0x42   : > { %190 = vrot.lane.b32.xlu0 %v188_v4, %s509_s29  ;;  %206 = vrot.lane.b32.xlu1 %v156_v3, %s508_s27 }
  0x43   : > { %p432_p3 = por %p431_p13, %p430_p7 }
  0x45   : > { %p433_p6 = pnand %p432_p3, %p426_p0 }
  0xac   : > { %v160_v7 = vpop.permute.xlu1 %159  ;;  %v158_v8 = vpop.permute.xlu0 %157 }
  0xad   : > { %v170_v9 = vsel %vm167_vm0, %v158_v8, %v160_v7 }
  0xae   : > { %v173_v10 = vmul.f32 0.97, %v170_v9 }
  0xb0   : > { %v177_v11 = vsub.f32 %v154_v0, %v173_v10  ;;  %v162_v12 = vpop.permute.xlu1 %161  ;;  %v164_v13 = vpop.permute.xlu0 %163 }
  0xb1   : > { %v169_v14 = vsel %vm167_vm0, %v160_v7, %v162_v12  ;;  %v168_v15 = vsel %vm167_vm0, %v162_v12, %v164_v13  ;;  %v171_v16 = vsel %vm167_vm0, %v164_v13, %v158_v8 }
  0xb2   : > { %181 = vst [vmem:[%s150_s30 + $0x8] sm:$0xff] %v177_v11  ;;  %v174_v17 = vmul.f32 0.97, %v169_v14  ;;  %v172_v18 = vmul.f32 0.97, %v171_v16 }
  0xb3   : > { %v175_v19 = vmul.f32 0.97, %v168_v15 }
  0xb4   : > { %v178_v20 = vsub.f32 %v155_v2, %v174_v17  ;;  %v176_v21 = vsub.f32 %v153_v1, %v172_v18  ;;  %v191_v23 = vpop.permute.xlu0 %190  ;;  %v207_v24 = vpop.permute.xlu1 %206 }
  0xb5   : > { %v179_v22 = vsub.f32 %v156_v3, %v175_v19  ;;  %v193_v25 = vsub.f32 %v153_v1, %v191_v23 }
  0xb6   : > { %182 = vst [vmem:[%s150_s30 + $0x10] sm:$0xff] %v178_v20  ;;  %180 = vst [vmem:[%s150_s30] sm:$0xff] %v176_v21 }
  0xb7   : > { %183 = vst [vmem:[%s150_s30 + $0x18] sm:$0xff] %v179_v22  ;;  %195 = vst.msk [vmem:[%s150_s30] sm:$0xff] %vm194_vm1, %v193_v25 }
  0xb8   : > { %436 = shalt.err (!%p433_p6)
}
  0xb9   : > { %s437_s17 = scalar_lea.hbm %s648_s5, 512  ;;  %s441_s24 = scalar_lea.hbm %s699_s1, 1024 }
  0xba   : > { %p438_p4 = scmp.ne.s32.totalorder %s648_s5, %s437_s17  ;;  %p442_p1 = scmp.lt.u32.totalorder %s648_s5, %s699_s1 }
  0xbb   : > { %p443_p2 = scmp.lt.u32.totalorder %s441_s24, %s437_s17  ;;  %p445_p8 = scmp.lt.u32.totalorder %s437_s17, %s648_s5 }
  0xbc   : > { %p439_p10 = pnand %p438_p4, %p708_p9 }
  0xbd   : > { %p444_p5 = por %p443_p2, %p442_p1 }
  0xbe   : > { %p440_p12 = pneg %p439_p10 }
  0xbf   : > { %p446_p11 = por %p445_p8, %p444_p5 }
  0xc1   : > { %p447_p0 = pnand %p446_p11, %p440_p12 }
  0xc3   : > { %450 = shalt.err (!%p447_p0)
}
  0xc4   : > { %331 = dma.vmem_to_hbm [thread:$0]  (%p708_p9), %s650_s2, 512, %s648_s5, %s212_s9  }
  0xc5 PF: > { %s240_s28 = sand.u32 1, %s485_s6   ;;  %p709_p7 = scmp.ne.s32.totalorder %s704_s21, 0 }
  0xc6   : > { %p710_p13 = scmp.ge.s32.totalorder %s505_s11, 2  ;;  %s241_s27 = scalar_lea.sflag [#allocation5], %s240_s28 }
  0xc8   : > { %p338_p3 = pnand %p710_p13, %p709_p7 }
  0xca   : > { %480 = dma.done.wait (!%p338_p3), %s241_s27, 512  }
  0xcb   : > { %482 = vsyncadd (!%p338_p3), %s241_s27, 4294966784  ;;  %s17_s11 = sadd.s32 1, %s505_s11   ;;  %s711_s6 = smov %s489_s7 }
  0xcc   : > { %p14_p6 = scmp.ge.s32.totalorder %s17_s11, 4   ;;  %s712_s7 = smov %s493_s8 }
  0xcd   : > { %s713_s8 = smov %s577_s20  ;;  %s714_s9 = smov %s501_s10 }
  0xce   : > { %s715_s10 = smov %s717_s14  ;;  %16 = sbr.rel (!%p14_p6) target bundleno = 6 (0x6), region = 77 }
  0xd5   :  { %246 = vsyncpa [#allocation4], 1 }
  0xd6   :  { %248 = vsyncpa [#allocation4 + $0x1], 1 }
  0xd7   :  { %249 = vsyncpa [#allocation5], 1 }
  0xd8   :  { %251 = vsyncpa [#allocation5 + $0x1], 1 }

</bundles_post_ra>
